<compile_context>
chip_gen: v7x
topology: tpu7x:2x2x1
jax: 0.10.0
libtpu: 0.0.40
codegen_flags: <defaults>
</compile_context>

<pallas_src>
import functools
import math

import jax
import jax.numpy as jnp
from jax.experimental import pallas as pl
from jax.experimental.pallas import tpu as pltpu

_LANE = 128


def _round_up(n, m):
    return ((n + m - 1) // m) * m


def _mlp_kernel(x_ref, w1_ref, b1_ref, w2_ref, b2_ref, a_ref, o_ref, *, n_classes):
    # Layer 1: Linear (bf16/f32 MXU operands, f32 accumulation) + bias.
    h = jnp.dot(x_ref[...], w1_ref[...], preferred_element_type=jnp.float32)
    h = h + b1_ref[...]
    # alpha == 0  -> exact ReLU;  alpha > 0 -> PReLU: max(0,h) + alpha*min(0,h).
    h = jnp.maximum(h, 0.0) + a_ref[...] * jnp.minimum(h, 0.0)

    # Layer 2: Linear -> logits (cast h back to the MXU dtype, f32 accumulate).
    logits = jnp.dot(h.astype(w2_ref.dtype), w2_ref[...],
                     preferred_element_type=jnp.float32) + b2_ref[...]

    # Class dim is zero-padded to 128 lanes; mask padded lanes out of the softmax.
    lane = jax.lax.broadcasted_iota(jnp.int32, logits.shape, 1)
    logits = jnp.where(lane < n_classes, logits, jnp.float32(-1e30))

    # Numerically stable log_softmax, all in f32.
    m = jnp.max(logits, axis=-1, keepdims=True)
    s = logits - m
    lse = jnp.log(jnp.sum(jnp.exp(s), axis=-1, keepdims=True))
    o_ref[...] = (s - lse).astype(o_ref.dtype)


def prepare_params(w1, b1, w2, b2, *, nonlinearity="relu", prelu_alpha=0.25,
                   compute_dtype=jnp.bfloat16):
    """Pad hidden/class dims to 128 lanes and cast MXU operands ONCE.

    w1: (in_dim, H), b1: (H,) or (1,H), w2: (H, C), b2: (C,) or (1,C).
    Returns an array-only tuple (w1p, b1p, w2p, b2p, alpha) — jit/closure friendly.
    """
    in_dim, H = w1.shape
    C = w2.shape[1]
    Hp = _round_up(H, _LANE)
    Cp = _round_up(C, _LANE)

    w1p = jnp.zeros((in_dim, Hp), compute_dtype).at[:, :H].set(w1.astype(compute_dtype))
    b1p = jnp.zeros((1, Hp), jnp.float32).at[:, :H].set(
        jnp.asarray(b1, jnp.float32).reshape(1, -1))
    w2p = jnp.zeros((Hp, Cp), compute_dtype).at[:H, :C].set(w2.astype(compute_dtype))
    b2p = jnp.zeros((1, Cp), jnp.float32).at[:, :C].set(
        jnp.asarray(b2, jnp.float32).reshape(1, -1))

    if nonlinearity == "relu":
        alpha = jnp.zeros((1, 1), jnp.float32)
    elif nonlinearity == "leaky_relu":  # nn.PReLU(), single learnable scalar (init 0.25)
        alpha = jnp.full((1, 1), prelu_alpha, jnp.float32)
    else:
        raise ValueError(f"unsupported nonlinearity: {nonlinearity}")
    # TODO(synk): hidden_layers > 1 not fused; only the default single hidden layer.
    return (w1p, b1p, w2p, b2p, alpha)


def mlp_forward(x, params, n_classes, *, tile_b=2048, out_dtype=jnp.float32,
                trim_output=True):
    """x: (B, x_dim, x_dim), (B, 1, x_dim, x_dim) or (B, x_dim**2).

    params: output of prepare_params().  Returns log-probabilities:
      trim_output=True  -> (B, n_classes) in out_dtype (matches the PyTorch module)
      trim_output=False -> (pB, 128) lane-dense padded block (rows >= B and lanes
                           >= n_classes are padding); avoids the trailing slice-copy.
    """
    w1p, b1p, w2p, b2p, alpha = params
    in_dim, Hp = w1p.shape
    Cp = w2p.shape[1]
    cdt = w1p.dtype

    # --- Single pass over x: reshape (view) + one cast to the MXU dtype.
    x2d = x.reshape(-1, in_dim)
    if x2d.dtype != cdt:
        x2d = x2d.astype(cdt)
    B = x2d.shape[0]

    # --- Pad batch only to a sublane multiple (8); typical batches need no copy.
    pB = _round_up(B, 8)
    if pB != B:
        x2d = jnp.pad(x2d, ((0, pB - B), (0, 0)))

    # --- Batch tile: big (amortize ~0.35us/step), but >= 2 grid steps when possible
    #     so the "parallel" batch axis uses both TensorCores on v7x.
    TB = max(8, min(tile_b, _round_up(pl.cdiv(pB, 2), 8)))
    TB = _round_up(TB, 8)
    n_steps = pl.cdiv(pB, TB)   # ragged last block: OOB reads are dropped rows,
                                # OOB writes are masked away by Pallas.

    itemsize = jnp.dtype(cdt).itemsize
    out_itemsize = jnp.dtype(out_dtype).itemsize
    rows = n_steps * TB
    cost = pl.CostEstimate(
        flops=2 * rows * (in_dim * Hp + Hp * Cp),
        transcendentals=rows * Cp,                       # exp in log-softmax
        bytes_accessed=(pB * in_dim * itemsize           # x
                        + in_dim * Hp * itemsize         # W1
                        + Hp * Cp * itemsize             # W2
                        + (Hp + Cp) * 4 + 4              # biases + alpha
                        + pB * Cp * out_itemsize),       # output
    )

    out = pl.pallas_call(
        functools.partial(_mlp_kernel, n_classes=n_classes),
        out_shape=jax.ShapeDtypeStruct((pB, Cp), out_dtype),
        grid_spec=pltpu.PrefetchScalarGridSpec(
            num_scalar_prefetch=0,
            grid=(n_steps,),
            in_specs=[
                pl.BlockSpec((TB, in_dim), lambda i: (i, 0)),   # activation stream
                pl.BlockSpec((in_dim, Hp), lambda i: (0, 0)),   # W1 resident
                pl.BlockSpec((1, Hp), lambda i: (0, 0)),        # b1 resident
                pl.BlockSpec((Hp, Cp), lambda i: (0, 0)),       # W2 resident
                pl.BlockSpec((1, Cp), lambda i: (0, 0)),        # b2 resident
                pl.BlockSpec((1, 1), lambda i: (0, 0)),         # PReLU alpha (0 == ReLU)
            ],
            out_specs=pl.BlockSpec((TB, Cp), lambda i: (i, 0)),  # lane-dense (TB,128)
        ),
        compiler_params=pltpu.CompilerParams(
            dimension_semantics=("parallel",),   # shard batch steps across TCs on v7x
            vmem_limit_bytes=32 * 1024 * 1024,   # ~13MB used at TB=2048 bf16 -> headroom
        ),
        cost_estimate=cost,
    )(x2d, w1p, b1p, w2p, b2p, alpha)

    if trim_output:
        return out[:B, :n_classes]
    return out


def init_params(key, x_dim=28, hidden_size=32, n_classes=10):
    """PyTorch nn.Linear default init: U[-1/sqrt(fan_in), 1/sqrt(fan_in)]."""
    in_dim = x_dim * x_dim
    k1, k2, k3, k4 = jax.random.split(key, 4)
    lim1 = 1.0 / math.sqrt(in_dim)
    lim2 = 1.0 / math.sqrt(hidden_size)
    w1 = jax.random.uniform(k1, (in_dim, hidden_size), jnp.float32, -lim1, lim1)
    b1 = jax.random.uniform(k2, (1, hidden_size), jnp.float32, -lim1, lim1)
    w2 = jax.random.uniform(k3, (hidden_size, n_classes), jnp.float32, -lim2, lim2)
    b2 = jax.random.uniform(k4, (1, n_classes), jnp.float32, -lim2, lim2)
    return w1, b1, w2, b2


if __name__ == "__main__":
    key = jax.random.PRNGKey(0)
    kx, kp = jax.random.split(key)

    B, X_DIM, HIDDEN, N_CLASSES = 2, 28, 32, 10
    # PyTorch-style NCHW image input (B, 1, 28, 28); flattened inside the wrapper.
    x = jax.random.normal(kx, (B, 1, X_DIM, X_DIM), jnp.float32)
    w1, b1, w2, b2 = init_params(kp, X_DIM, HIDDEN, N_CLASSES)
    x2d = x.reshape(-1, X_DIM * X_DIM)

    # 1) ReLU, f32 operand path: exactness vs plain-JAX reference.
    p_f32 = prepare_params(w1, b1, w2, b2, compute_dtype=jnp.float32)
    out_f32 = mlp_forward(x, p_f32, N_CLASSES)
    jax.block_until_ready(out_f32)
    ref_f32 = jax.nn.log_softmax(jnp.maximum(x2d @ w1 + b1, 0.0) @ w2 + b2, axis=-1)
    assert out_f32.shape == (B, N_CLASSES)
    assert jnp.allclose(out_f32, ref_f32, atol=1e-5, rtol=1e-5)

    # 2) Default fast path: bf16 MXU operands, f32 accumulation / softmax.
    p_bf16 = prepare_params(w1, b1, w2, b2)
    out_bf16 = mlp_forward(x, p_bf16, N_CLASSES)
    jax.block_until_ready(out_bf16)
    h_ref = jnp.maximum(
        jnp.dot(x2d.astype(jnp.bfloat16), w1.astype(jnp.bfloat16),
                preferred_element_type=jnp.float32) + b1, 0.0)
    logits_bf = jnp.dot(h_ref.astype(jnp.bfloat16), w2.astype(jnp.bfloat16),
                        preferred_element_type=jnp.float32) + b2
    ref_bf = jax.nn.log_softmax(logits_bf, axis=-1)
    assert out_bf16.shape == (B, N_CLASSES)
    assert jnp.allclose(out_bf16, ref_bf, atol=1e-3, rtol=1e-3)

    # 3) PReLU ('leaky_relu') path, f32 operands.
    p_prelu = prepare_params(w1, b1, w2, b2, nonlinearity="leaky_relu",
                             compute_dtype=jnp.float32)
    out_pr = mlp_forward(x, p_prelu, N_CLASSES)
    jax.block_until_ready(out_pr)
    h_lin = x2d @ w1 + b1
    h_pr = jnp.where(h_lin > 0, h_lin, 0.25 * h_lin)
    ref_pr = jax.nn.log_softmax(h_pr @ w2 + b2, axis=-1)
    assert jnp.allclose(out_pr, ref_pr, atol=1e-5, rtol=1e-5)

    # 4) Multi-step grid with a ragged last block (batch not a multiple of the tile).
    xb = jax.random.normal(jax.random.PRNGKey(1), (19, X_DIM * X_DIM), jnp.float32)
    out_r = mlp_forward(xb, p_f32, N_CLASSES, tile_b=16)
    jax.block_until_ready(out_r)
    ref_r = jax.nn.log_softmax(jnp.maximum(xb @ w1 + b1, 0.0) @ w2 + b2, axis=-1)
    assert out_r.shape == (19, N_CLASSES)
    assert jnp.allclose(out_r, ref_r, atol=1e-5, rtol=1e-5)

    print("KERNEL_OK")
</pallas_src>

<mosaic_0001>
module attributes {stable_mosaic.version = 11 : i64} {
  func.func @_mlp_kernel(%arg0: i32, %arg1: memref<8x784xf32, #tpu.memory_space<vmem>>, %arg2: memref<784x128xf32, #tpu.memory_space<vmem>>, %arg3: memref<1x128xf32, #tpu.memory_space<vmem>>, %arg4: memref<128x128xf32, #tpu.memory_space<vmem>>, %arg5: memref<1x128xf32, #tpu.memory_space<vmem>>, %arg6: memref<1x1xf32, #tpu.memory_space<vmem>>, %arg7: memref<8x128xf32, #tpu.memory_space<vmem>>) attributes {dimension_semantics = [#tpu.dimension_semantics<parallel>], iteration_bounds = array<i64: 1>, scalar_prefetch = 0 : i64, scratch_operands = 0 : i64, tpu.core_type = #tpu.core_type<tc>, window_params = [{transform_indices = @transform_0, window_bounds = array<i64: 8, 784>}, {pipeline_mode = #tpu.pipeline_mode<synchronous>, transform_indices = @transform_1, window_bounds = array<i64: 784, 128>}, {pipeline_mode = #tpu.pipeline_mode<synchronous>, transform_indices = @transform_2, window_bounds = array<i64: 1, 128>}, {pipeline_mode = #tpu.pipeline_mode<synchronous>, transform_indices = @transform_3, window_bounds = array<i64: 128, 128>}, {pipeline_mode = #tpu.pipeline_mode<synchronous>, transform_indices = @transform_4, window_bounds = array<i64: 1, 128>}, {pipeline_mode = #tpu.pipeline_mode<synchronous>, transform_indices = @transform_5, window_bounds = array<i64: 1, 1>}, {transform_indices = @transform_6, window_bounds = array<i64: 8, 128>}]} {
    %c0 = arith.constant 0 : index
    %c0_0 = arith.constant 0 : index
    %0 = vector.load %arg1[%c0, %c0_0] : memref<8x784xf32, #tpu.memory_space<vmem>>, vector<8x784xf32>
    %c0_1 = arith.constant 0 : index
    %c0_2 = arith.constant 0 : index
    %1 = vector.load %arg2[%c0_1, %c0_2] : memref<784x128xf32, #tpu.memory_space<vmem>>, vector<784x128xf32>
    %cst = arith.constant dense<0.000000e+00> : vector<8x128xf32>
    %2 = tpu.matmul %0, %1, %cst {dimension_numbers = #tpu.dot_dimension_numbers<[1], [0], [0], [1], [0, 0, 1, 1], [], []>} : vector<8x784xf32>, vector<784x128xf32>, vector<8x128xf32> -> vector<8x128xf32>
    %c0_3 = arith.constant 0 : index
    %c0_4 = arith.constant 0 : index
    %3 = vector.load %arg3[%c0_3, %c0_4] : memref<1x128xf32, #tpu.memory_space<vmem>>, vector<1x128xf32>
    %4 = vector.broadcast %3 : vector<1x128xf32> to vector<8x128xf32>
    %5 = arith.addf %2, %4 : vector<8x128xf32>
    %cst_5 = arith.constant 0.000000e+00 : f32
    %6 = vector.broadcast %cst_5 : f32 to vector<8x128xf32>
    %7 = arith.maximumf %5, %6 : vector<8x128xf32>
    %c0_6 = arith.constant 0 : index
    %c0_7 = arith.constant 0 : index
    %8 = vector.load %arg6[%c0_6, %c0_7] : memref<1x1xf32, #tpu.memory_space<vmem>>, vector<1x1xf32>
    %cst_8 = arith.constant 0.000000e+00 : f32
    %9 = vector.broadcast %cst_8 : f32 to vector<8x128xf32>
    %10 = arith.minimumf %5, %9 : vector<8x128xf32>
    %11 = vector.broadcast %8 : vector<1x1xf32> to vector<8x128xf32>
    %12 = arith.mulf %11, %10 : vector<8x128xf32>
    %13 = arith.addf %7, %12 : vector<8x128xf32>
    %c0_9 = arith.constant 0 : index
    %c0_10 = arith.constant 0 : index
    %14 = vector.load %arg4[%c0_9, %c0_10] : memref<128x128xf32, #tpu.memory_space<vmem>>, vector<128x128xf32>
    %cst_11 = arith.constant dense<0.000000e+00> : vector<8x128xf32>
    %15 = tpu.matmul %13, %14, %cst_11 {dimension_numbers = #tpu.dot_dimension_numbers<[1], [0], [0], [1], [0, 0, 1, 1], [], []>} : vector<8x128xf32>, vector<128x128xf32>, vector<8x128xf32> -> vector<8x128xf32>
    %c0_12 = arith.constant 0 : index
    %c0_13 = arith.constant 0 : index
    %16 = vector.load %arg5[%c0_12, %c0_13] : memref<1x128xf32, #tpu.memory_space<vmem>>, vector<1x128xf32>
    %17 = vector.broadcast %16 : vector<1x128xf32> to vector<8x128xf32>
    %18 = arith.addf %15, %17 : vector<8x128xf32>
    %19 = tpu.iota {dimensions = array<i32: 1>} : vector<8x128xi32>
    %c10_i32 = arith.constant 10 : i32
    %20 = vector.broadcast %c10_i32 : i32 to vector<8x128xi32>
    %21 = arith.cmpi slt, %19, %20 : vector<8x128xi32>
    %cst_14 = arith.constant -1.000000e+30 : f32
    %22 = vector.broadcast %cst_14 : f32 to vector<8x128xf32>
    %23 = arith.select %21, %18, %22 : vector<8x128xi1>, vector<8x128xf32>
    %cst_15 = arith.constant dense<0xFF800000> : vector<8xf32>
    %24 = vector.multi_reduction <maximumf>, %23, %cst_15 [1] : vector<8x128xf32> to vector<8xf32>
    %25 = vector.shape_cast %24 : vector<8xf32> to vector<8x1xf32>
    %26 = vector.broadcast %25 : vector<8x1xf32> to vector<8x128xf32>
    %27 = arith.subf %23, %26 : vector<8x128xf32>
    %28 = math.exp %27 : vector<8x128xf32>
    %cst_16 = arith.constant dense<0.000000e+00> : vector<8xf32>
    %29 = vector.multi_reduction <add>, %28, %cst_16 [1] : vector<8x128xf32> to vector<8xf32>
    %30 = vector.shape_cast %29 : vector<8xf32> to vector<8x1xf32>
    %31 = math.log %30 : vector<8x1xf32>
    %32 = vector.broadcast %31 : vector<8x1xf32> to vector<8x128xf32>
    %33 = arith.subf %27, %32 : vector<8x128xf32>
    %c0_17 = arith.constant 0 : index
    %c0_18 = arith.constant 0 : index
    %34 = vector.load %arg7[%c0_17, %c0_18] : memref<8x128xf32, #tpu.memory_space<vmem>>, vector<8x128xf32>
    tpu.vector_store %arg7[%c0_17, %c0_18], %33 {strides = array<i32>} : memref<8x128xf32, #tpu.memory_space<vmem>>, vector<8x128xf32>,
    return
  }
  func.func @transform_0(%arg0: i32) -> (i32, i32) {
    %c0_i32 = arith.constant 0 : i32
    %c0_i32_0 = arith.constant 0 : i32
    return %arg0, %c0_i32 : i32, i32
  }
  func.func @transform_1(%arg0: i32) -> (i32, i32) {
    %c0_i32 = arith.constant 0 : i32
    %c0_i32_0 = arith.constant 0 : i32
    %c0_i32_1 = arith.constant 0 : i32
    return %c0_i32, %c0_i32_0 : i32, i32
  }
  func.func @transform_2(%arg0: i32) -> (i32, i32) {
    %c0_i32 = arith.constant 0 : i32
    %c0_i32_0 = arith.constant 0 : i32
    %c0_i32_1 = arith.constant 0 : i32
    return %c0_i32, %c0_i32_0 : i32, i32
  }
  func.func @transform_3(%arg0: i32) -> (i32, i32) {
    %c0_i32 = arith.constant 0 : i32
    %c0_i32_0 = arith.constant 0 : i32
    %c0_i32_1 = arith.constant 0 : i32
    return %c0_i32, %c0_i32_0 : i32, i32
  }
  func.func @transform_4(%arg0: i32) -> (i32, i32) {
    %c0_i32 = arith.constant 0 : i32
    %c0_i32_0 = arith.constant 0 : i32
    %c0_i32_1 = arith.constant 0 : i32
    return %c0_i32, %c0_i32_0 : i32, i32
  }
  func.func @transform_5(%arg0: i32) -> (i32, i32) {
    %c0_i32 = arith.constant 0 : i32
    %c0_i32_0 = arith.constant 0 : i32
    %c0_i32_1 = arith.constant 0 : i32
    return %c0_i32, %c0_i32_0 : i32, i32
  }
  func.func @transform_6(%arg0: i32) -> (i32, i32) {
    %c0_i32 = arith.constant 0 : i32
    %c0_i32_0 = arith.constant 0 : i32
    return %arg0, %c0_i32 : i32, i32
  }
}

</mosaic_0001>

<bundles_post_ra>
// kernel: tpu_custom_call.1
= control target key start
LH: loop header
LB: loop body
LE: loop exit
PB: predicated region body
PF: predicated region fallthrough
CT: control target
= control target key end

     0   :  { %s1121_s0 = inlined_call_operand.hbm [shape: f32[8,784], index: 0, kind: input, shape index: {}]   ;;  %s1122_s1 = inlined_call_operand.hbm [shape: f32[784,128], index: 1, kind: input, shape index: {}]   ;;  %s1123_s2 = inlined_call_operand.vmem [shape: f32[1,128], index: 2, kind: input, shape index: {}]   ;;  %s1124_s3 = inlined_call_operand.hbm [shape: f32[128,128], index: 3, kind: input, shape index: {}]   ;;  %s1125_s4 = inlined_call_operand.vmem [shape: f32[1,128], index: 4, kind: input, shape index: {}]   ;;  %s1126_s5 = inlined_call_operand.<no memory space> [shape: f32[1,1], index: 5, kind: input, shape index: {}]   ;;  %s1127_s6 = inlined_call_operand.hbm [shape: f32[8,128], index: 6, kind: output, shape index: {}]  }
   0x1   :  { %v11_v0 = vstv %s1126_s5 }
   0x2   :  { %12 = vst [vmem:[#allocation2] sm:$0x1] %v11_v0 }
   0x3   :  { %13 = vsyncpa [#allocation4], 0 }
   0x4   :  { %14 = vsyncpa [#allocation7], 0 }
   0x5   :  { %15 = vsyncpa [#allocation5], 0  ;;  %s1002_s23 = smov [#allocation6]   ;;  %s908_s27 = scalar_lea.hbm %s1122_s1, 12544 }
   0x6   :  { %s31_s24 = sshll.u32 %s1002_s23, 4  ;;  %p909_p0 = scmp.ne.s32.totalorder %s1122_s1, %s908_s27  ;;  %s32_s24 = int_to_ptr.vmem [resolvable:$true] %s31_s24 }
   0x7   :  { %p912_p1 = scmp.lt.u32.totalorder %s908_s27, %s1122_s1 }
   0x9   :  { %p914_p2 = pnand %p912_p1, %p909_p0 }
   0xb   :  { %917 = shalt.err (!%p914_p2)
}
   0xc   :  { %s918_s5 = scalar_lea.vmem %s32_s24, 12544  ;;  %p923_p4 = scmp.lt.s32.totalorder %s32_s24, %s32_s24 }
   0xd   :  { %p919_p3 = scmp.ne.s32.totalorder %s32_s24, %s918_s5  ;;  %p924_p5 = scmp.lt.s32.totalorder %s918_s5, %s918_s5 }
   0xf   :  { %p925_p6 = por %p924_p5, %p923_p4 }
  0x11   :  { %p926_p7 = pnand %p925_p6, %p919_p3 }
  0x13   :  { %929 = shalt.err (!%p926_p7)
}
  0x14   :  { %s1003_s8 = smov 128   ;;  %s1004_s9 = smov 8  }
  0x15   :  { %37 = dma.hbm_to_vmem [thread:$0]  %s1122_s1, 12544, %s32_s24, [#allocation7], %s1003_s8, %s1003_s8, %s1004_s9  }
  0x16   :  { %s1005_s12 = smov [#allocation3]   ;;  %s1006_s14 = smov [#allocation8]  }
  0x17   :  { %s22_s13 = sshll.u32 %s1005_s12, 4  ;;  %s45_s15 = sshll.u32 %s1006_s14, 4  ;;  %s23_s13 = int_to_ptr.vmem [resolvable:$true] %s22_s13  ;;  %s46_s15 = int_to_ptr.vmem [resolvable:$true] %s45_s15 }
  0x18   :  { %s930_s18 = scalar_lea.hbm %s1121_s0, 896 }
  0x19   :  { %p931_p8 = scmp.ne.s32.totalorder %s1121_s0, %s930_s18  ;;  %p934_p9 = scmp.lt.u32.totalorder %s930_s18, %s1121_s0 }
  0x1b   :  { %p936_p10 = pnand %p934_p9, %p931_p8 }
  0x1d   :  { %939 = shalt.err (!%p936_p10)
}
  0x1e   :  { %s940_s1 = scalar_lea.vmem %s23_s13, 896  ;;  %p945_p12 = scmp.lt.s32.totalorder %s23_s13, %s23_s13 }
  0x1f   :  { %p941_p11 = scmp.ne.s32.totalorder %s23_s13, %s940_s1  ;;  %p946_p13 = scmp.lt.s32.totalorder %s940_s1, %s940_s1 }
  0x21   :  { %p947_p0 = por %p946_p13, %p945_p12 }
  0x23   :  { %p948_p1 = pnand %p947_p0, %p941_p11 }
  0x25   :  { %951 = shalt.err (!%p948_p1)
}
  0x26   :  { %25 = dma.hbm_to_vmem [thread:$0]  %s1121_s0, 896, %s23_s13, [#allocation4]  }
  0x27   :  { %s952_s27 = scalar_lea.hbm %s1124_s3, 2048 }
  0x28   :  { %p953_p2 = scmp.ne.s32.totalorder %s1124_s3, %s952_s27  ;;  %p956_p3 = scmp.lt.u32.totalorder %s952_s27, %s1124_s3 }
  0x2a   :  { %p958_p4 = pnand %p956_p3, %p953_p2 }
  0x2c   :  { %961 = shalt.err (!%p958_p4)
}
  0x2d   :  { %s962_s5 = scalar_lea.vmem %s46_s15, 2048  ;;  %p967_p6 = scmp.lt.s32.totalorder %s46_s15, %s46_s15 }
  0x2e   :  { %p963_p5 = scmp.ne.s32.totalorder %s46_s15, %s962_s5  ;;  %p968_p7 = scmp.lt.s32.totalorder %s962_s5, %s962_s5 }
  0x30   :  { %p969_p8 = por %p968_p7, %p967_p6 }
  0x32   :  { %p970_p9 = pnand %p969_p8, %p963_p5 }
  0x34   :  { %973 = shalt.err (!%p970_p9)
}
  0x35   :  { %51 = dma.hbm_to_vmem [thread:$0]  %s1124_s3, 2048, %s46_s15, [#allocation7], %s1003_s8, %s1003_s8, %s1004_s9  }
  0x36   :  { %996 = dma.done.wait [#allocation4], 896  }
  0x37   :  { %997 = vsyncadd [#allocation4], 4294966400 }
  0x38   :  { %998 = dma.done.wait [#allocation7], 14592  }
  0x39   :  { %999 = vsyncadd [#allocation7], 4294952704  ;;  %v1007_v1 = vmov 0   ;;  %v88_v2 = vld [vmem:[#allocation6 + $0x80] sm:$0xff]  ;;  %v89_v3 = vld [vmem:[#allocation6 + $0x88] sm:$0xff]  ;;  %vm1009_vm0 = vmmov 0  }
  0x3a   :  { %903 = vset.pattern.permute.xlu0 %v1007_v1  ;;  %v72_v4 = vld [vmem:[#allocation6] sm:$0xff]  ;;  %v770_v5 = vpack.c.bf16 %v89_v3, %v88_v2  ;;  %v73_v6 = vld [vmem:[#allocation6 + $0x8] sm:$0xff]  ;;  %v90_v13 = vld [vmem:[#allocation6 + $0x90] sm:$0xff]  ;;  %vm177_vm1 = vcmask 130048   ;;  %s1011_s11 = smov [#allocation9]  }
  0x3b   :  { %v120_v7 = vld [vmem:[#allocation6 + $0x180] sm:$0xff]  ;;  %v121_v8 = vld [vmem:[#allocation6 + $0x188] sm:$0xff]  ;;  %v772_v9 = vpack.c.bf16 %v73_v6, %v72_v4  ;;  %v91_v15 = vld [vmem:[#allocation6 + $0x98] sm:$0xff]  ;;  %s589_s12 = sshll.u32 %s1011_s11, 4  ;;  %s590_s12 = int_to_ptr.vmem [resolvable:$true] %s589_s12 }
  0x3c   :  { %v802_v10 = vpack.c.bf16 %v121_v8, %v120_v7  ;;  %v104_v11 = vld [vmem:[#allocation6 + $0x100] sm:$0xff]  ;;  %v105_v12 = vld [vmem:[#allocation6 + $0x108] sm:$0xff]  ;;  %771 = vmatprep.subr.bf16.mxu0 %v770_v5  ;;  %v74_v16 = vld [vmem:[#allocation6 + $0x10] sm:$0xff]  ;;  %v774_v18 = vpack.c.bf16 %v91_v15, %v90_v13  ;;  %p979_p11 = scmp.lt.s32.totalorder %s590_s12, %s590_s12 }
  0x3d   :  { %v804_v14 = vpack.c.bf16 %v105_v12, %v104_v11  ;;  %v75_v17 = vld [vmem:[#allocation6 + $0x18] sm:$0xff]  ;;  %773 = vmatpush3.bf16.msra.mxu0 %v772_v9  ;;  %v122_v20 = vld [vmem:[#allocation6 + $0x190] sm:$0xff]  ;;  %v92_v25 = vld [vmem:[#allocation6 + $0xa0] sm:$0xff] }
  0x3e   :  { %803 = vmatprep.subr.bf16.mxu1 %v802_v10  ;;  %v776_v19 = vpack.c.bf16 %v75_v17, %v74_v16  ;;  %v123_v21 = vld [vmem:[#allocation6 + $0x198] sm:$0xff]  ;;  %v106_v22 = vld [vmem:[#allocation6 + $0x110] sm:$0xff]  ;;  %v93_v26 = vld [vmem:[#allocation6 + $0xa8] sm:$0xff]  ;;  %775 = vmatprep.subr.bf16.mxu0 %v774_v18 }
  0x3f   :  { %805 = vmatpush3.bf16.msra.mxu1 %v804_v14  ;;  %v806_v23 = vpack.c.bf16 %v123_v21, %v122_v20  ;;  %v107_v24 = vld [vmem:[#allocation6 + $0x118] sm:$0xff]  ;;  %v778_v28 = vpack.c.bf16 %v93_v26, %v92_v25  ;;  %v76_v29 = vld [vmem:[#allocation6 + $0x20] sm:$0xff]  ;;  %v77_v30 = vld [vmem:[#allocation6 + $0x28] sm:$0xff] }
  0x40   :  { %v808_v27 = vpack.c.bf16 %v107_v24, %v106_v22  ;;  %v124_v31 = vld [vmem:[#allocation6 + $0x1a0] sm:$0xff]  ;;  %v125_v32 = vld [vmem:[#allocation6 + $0x1a8] sm:$0xff]  ;;  %v780_v35 = vpack.c.bf16 %v77_v30, %v76_v29  ;;  %v94_v37 = vld [vmem:[#allocation6 + $0xb0] sm:$0xff] }
  0x41   :  { %807 = vmatprep.subr.bf16.mxu1 %v806_v23  ;;  %v108_v33 = vld [vmem:[#allocation6 + $0x120] sm:$0xff]  ;;  %v109_v34 = vld [vmem:[#allocation6 + $0x128] sm:$0xff]  ;;  %777 = vmatpush3.bf16.msra.mxu0 %v776_v19  ;;  %v810_v36 = vpack.c.bf16 %v125_v32, %v124_v31  ;;  %v95_v38 = vld [vmem:[#allocation6 + $0xb8] sm:$0xff] }
  0x42   :  { %v78_v39 = vld [vmem:[#allocation6 + $0x30] sm:$0xff]  ;;  %779 = vmatprep.subr.bf16.mxu0 %v778_v28  ;;  %v812_v40 = vpack.c.bf16 %v109_v34, %v108_v33  ;;  %v782_v41 = vpack.c.bf16 %v95_v38, %v94_v37  ;;  %v79_v42 = vld [vmem:[#allocation6 + $0x38] sm:$0xff]  ;;  %v96_v48 = vld [vmem:[#allocation6 + $0xc0] sm:$0xff] }
  0x43   :  { %809 = vmatpush3.bf16.msra.mxu1 %v808_v27  ;;  %v126_v43 = vld [vmem:[#allocation6 + $0x1b0] sm:$0xff]  ;;  %v127_v44 = vld [vmem:[#allocation6 + $0x1b8] sm:$0xff]  ;;  %v97_v49 = vld [vmem:[#allocation6 + $0xc8] sm:$0xff]  ;;  %v784_v50 = vpack.c.bf16 %v79_v42, %v78_v39 }
  0x44   :  { %811 = vmatprep.subr.bf16.mxu1 %v810_v36  ;;  %v814_v45 = vpack.c.bf16 %v127_v44, %v126_v43  ;;  %v110_v46 = vld [vmem:[#allocation6 + $0x130] sm:$0xff]  ;;  %v111_v47 = vld [vmem:[#allocation6 + $0x138] sm:$0xff]  ;;  %v128_v51 = vld [vmem:[#allocation6 + $0x1c0] sm:$0xff]  ;;  %v786_v54 = vpack.c.bf16 %v97_v49, %v96_v48 }
  0x45   :  { %781 = vmatpush3.bf16.msra.mxu0 %v780_v35  ;;  %v129_v52 = vld [vmem:[#allocation6 + $0x1c8] sm:$0xff]  ;;  %v816_v53 = vpack.c.bf16 %v111_v47, %v110_v46  ;;  %v80_v55 = vld [vmem:[#allocation6 + $0x40] sm:$0xff]  ;;  %v98_v60 = vld [vmem:[#allocation6 + $0xd0] sm:$0xff] }
  0x46   :  { %783 = vmatprep.subr.bf16.mxu0 %v782_v41  ;;  %v81_v56 = vld [vmem:[#allocation6 + $0x48] sm:$0xff]  ;;  %v112_v57 = vld [vmem:[#allocation6 + $0x140] sm:$0xff]  ;;  %v818_v58 = vpack.c.bf16 %v129_v52, %v128_v51  ;;  %v99_v61 = vld [vmem:[#allocation6 + $0xd8] sm:$0xff]  ;;  %v1008_v52 = vmov 0.0|0.0  }
  0x47   :  { %813 = vmatpush3.bf16.msra.mxu1 %v812_v40  ;;  %v113_v59 = vld [vmem:[#allocation6 + $0x148] sm:$0xff]  ;;  %v130_v62 = vld [vmem:[#allocation6 + $0x1d0] sm:$0xff]  ;;  %v131_v63 = vld [vmem:[#allocation6 + $0x1d8] sm:$0xff]  ;;  %v788_v0 = vpack.c.bf16 %v81_v56, %v80_v55  ;;  %v790_v2 = vpack.c.bf16 %v99_v61, %v98_v60 }
  0x48   :  { %815 = vmatprep.subr.bf16.mxu1 %v814_v45  ;;  %v820_v1 = vpack.c.bf16 %v113_v59, %v112_v57  ;;  %v82_v3 = vld [vmem:[#allocation6 + $0x50] sm:$0xff]  ;;  %v83_v4 = vld [vmem:[#allocation6 + $0x58] sm:$0xff]  ;;  %v822_v6 = vpack.c.bf16 %v131_v63, %v130_v62  ;;  %v100_v8 = vld [vmem:[#allocation6 + $0xe0] sm:$0xff]  ;;  %v1010_v63 = vmov 0.0  }
  0x49   :  { %785 = vmatpush3.bf16.msra.mxu0 %v784_v50  ;;  %v114_v5 = vld [vmem:[#allocation6 + $0x150] sm:$0xff]  ;;  %v115_v7 = vld [vmem:[#allocation6 + $0x158] sm:$0xff]  ;;  %v101_v9 = vld [vmem:[#allocation6 + $0xe8] sm:$0xff]  ;;  %v792_v12 = vpack.c.bf16 %v83_v4, %v82_v3 }
  0x4a   :  { %787 = vmatprep.subr.bf16.mxu0 %v786_v54  ;;  %v132_v10 = vld [vmem:[#allocation6 + $0x1e0] sm:$0xff]  ;;  %v133_v11 = vld [vmem:[#allocation6 + $0x1e8] sm:$0xff]  ;;  %v66_v14 = vld [vmem:[#allocation3 + $0x8] sm:$0xff]  ;;  %v824_v15 = vpack.c.bf16 %v115_v7, %v114_v5  ;;  %v794_v16 = vpack.c.bf16 %v101_v9, %v100_v8 }
  0x4b   :  { %817 = vmatpush3.bf16.msra.mxu1 %v816_v53  ;;  %v84_v13 = vld [vmem:[#allocation6 + $0x60] sm:$0xff]  ;;  %v85_v17 = vld [vmem:[#allocation6 + $0x68] sm:$0xff]  ;;  %v826_v20 = vpack.c.bf16 %v133_v11, %v132_v10  ;;  %v102_v21 = vld [vmem:[#allocation6 + $0xf0] sm:$0xff]  ;;  %245 = vmatprep.mubr.f32.mxu0 %v66_v14 }
  0x4c   :  { %819 = vmatprep.subr.bf16.mxu1 %v818_v58  ;;  %v116_v18 = vld [vmem:[#allocation6 + $0x160] sm:$0xff]  ;;  %v117_v19 = vld [vmem:[#allocation6 + $0x168] sm:$0xff]  ;;  %v103_v22 = vld [vmem:[#allocation6 + $0xf8] sm:$0xff]  ;;  %v796_v26 = vpack.c.bf16 %v85_v17, %v84_v13 }
  0x4d   :  { %789 = vmatpush3.bf16.msra.mxu0 %v788_v0  ;;  %v68_v23 = vld [vmem:[#allocation3 + $0x18] sm:$0xff]  ;;  %v134_v24 = vld [vmem:[#allocation6 + $0x1f0] sm:$0xff]  ;;  %v135_v25 = vld [vmem:[#allocation6 + $0x1f8] sm:$0xff]  ;;  %v828_v27 = vpack.c.bf16 %v117_v19, %v116_v18  ;;  %v798_v28 = vpack.c.bf16 %v103_v22, %v102_v21 }
  0x4e   :  { %791 = vmatprep.subr.bf16.mxu0 %v790_v2  ;;  %315 = vmatprep.mubr.f32.mxu1 %v68_v23  ;;  %v86_v29 = vld [vmem:[#allocation6 + $0x70] sm:$0xff]  ;;  %v87_v30 = vld [vmem:[#allocation6 + $0x78] sm:$0xff]  ;;  %v830_v32 = vpack.c.bf16 %v135_v25, %v134_v24  ;;  %v152_v34 = vld [vmem:[#allocation6 + $0x280] sm:$0xff] }
  0x4f   :  { %821 = vmatpush3.bf16.msra.mxu1 %v820_v1  ;;  %v118_v31 = vld [vmem:[#allocation6 + $0x170] sm:$0xff]  ;;  %v119_v33 = vld [vmem:[#allocation6 + $0x178] sm:$0xff]  ;;  %v153_v35 = vld [vmem:[#allocation6 + $0x288] sm:$0xff]  ;;  %v800_v36 = vpack.c.bf16 %v87_v30, %v86_v29 }
  0x50   :  { %823 = vmatprep.subr.bf16.mxu1 %v822_v6  ;;  %v832_v37 = vpack.c.bf16 %v119_v33, %v118_v31  ;;  %v834_v38 = vpack.c.bf16 %v153_v35, %v152_v34  ;;  %v136_v39 = vld [vmem:[#allocation6 + $0x200] sm:$0xff]  ;;  %v137_v40 = vld [vmem:[#allocation6 + $0x208] sm:$0xff]  ;;  %v154_v41 = vld [vmem:[#allocation6 + $0x290] sm:$0xff] }
  0x51   :  { %793 = vmatpush3.bf16.msra.mxu0 %v792_v12  ;;  %v155_v42 = vld [vmem:[#allocation6 + $0x298] sm:$0xff]  ;;  %v65_v43 = vld [vmem:[#allocation3] sm:$0xff]  ;;  %v836_v44 = vpack.c.bf16 %v137_v40, %v136_v39  ;;  %v138_v46 = vld [vmem:[#allocation6 + $0x210] sm:$0xff] }
  0x52   :  { %795 = vmatprep.subr.bf16.mxu0 %v794_v16  ;;  %v67_v45 = vld [vmem:[#allocation3 + $0x10] sm:$0xff]  ;;  %v838_v47 = vpack.c.bf16 %v155_v42, %v154_v41  ;;  %v156_v49 = vld [vmem:[#allocation6 + $0x2a0] sm:$0xff]  ;;  %v157_v50 = vld [vmem:[#allocation6 + $0x2a8] sm:$0xff] }
  0x53   :  { %825 = vmatpush3.bf16.msra.mxu1 %v824_v15  ;;  %v139_v48 = vld [vmem:[#allocation6 + $0x218] sm:$0xff]  ;;  %v70_v51 = vld [vmem:[#allocation3 + $0x28] sm:$0xff]  ;;  %v168_v53 = vld [vmem:[#allocation6 + $0x300] sm:$0xff]  ;;  %v842_v58 = vpack.c.bf16 %v157_v50, %v156_v49 }
  0x54   :  { %827 = vmatprep.subr.bf16.mxu1 %v826_v20  ;;  %v169_v54 = vld [vmem:[#allocation6 + $0x308] sm:$0xff]  ;;  %v840_v56 = vpack.c.bf16 %v139_v48, %v138_v46  ;;  %v601_v57 = vld [vmem:[#allocation2] ss:$0 sm:$0xff]  ;;  %v158_v61 = vld [vmem:[#allocation6 + $0x2b0] sm:$0xff] }
  0x55   :  { %797 = vmatpush3.bf16.msra.mxu0 %v796_v26  ;;  %v867_v55 = vpack.c.bf16 %v169_v54, %v168_v53  ;;  %v140_v59 = vld [vmem:[#allocation6 + $0x220] sm:$0xff]  ;;  %v141_v60 = vld [vmem:[#allocation6 + $0x228] sm:$0xff]  ;;  %v159_v62 = vld [vmem:[#allocation6 + $0x2b8] sm:$0xff]  ;;  %470 = vperm.xlu0 %903, %v601_v57  }
  0x56   :  { %799 = vmatprep.subr.bf16.mxu0 %v798_v28  ;;  %v71_v0 = vld [vmem:[#allocation3 + $0x30] sm:$0xff]  ;;  %v844_v1 = vpack.c.bf16 %v141_v60, %v140_v59  ;;  %v846_v2 = vpack.c.bf16 %v159_v62, %v158_v61  ;;  %v142_v3 = vld [vmem:[#allocation6 + $0x230] sm:$0xff]  ;;  %v160_v5 = vld [vmem:[#allocation6 + $0x2c0] sm:$0xff] }
  0x57   :  { %829 = vmatpush3.bf16.msra.mxu1 %v828_v27  ;;  %v143_v4 = vld [vmem:[#allocation6 + $0x238] sm:$0xff]  ;;  %v161_v6 = vld [vmem:[#allocation6 + $0x2c8] sm:$0xff]  ;;  %v144_v9 = vld [vmem:[#allocation6 + $0x240] sm:$0xff] }
  0x58   :  { %831 = vmatprep.subr.bf16.mxu1 %v830_v32  ;;  %v848_v7 = vpack.c.bf16 %v143_v4, %v142_v3  ;;  %v850_v8 = vpack.c.bf16 %v161_v6, %v160_v5  ;;  %v145_v10 = vld [vmem:[#allocation6 + $0x248] sm:$0xff]  ;;  %v162_v11 = vld [vmem:[#allocation6 + $0x2d0] sm:$0xff]  ;;  %v163_v12 = vld [vmem:[#allocation6 + $0x2d8] sm:$0xff] }
  0x59   :  { %801 = vmatpush3.bf16.msra.mxu0 %v800_v36  ;;  %v852_v13 = vpack.c.bf16 %v145_v10, %v144_v9  ;;  %v854_v14 = vpack.c.bf16 %v163_v12, %v162_v11  ;;  %v146_v15 = vld [vmem:[#allocation6 + $0x250] sm:$0xff]  ;;  %v147_v16 = vld [vmem:[#allocation6 + $0x258] sm:$0xff]  ;;  %v164_v17 = vld [vmem:[#allocation6 + $0x2e0] sm:$0xff]  ;;  %v568_v12 = vlaneseq }
  0x5a   :  { %835 = vmatprep.subr.bf16.mxu0 %v834_v38  ;;  %v165_v18 = vld [vmem:[#allocation6 + $0x2e8] sm:$0xff]  ;;  %v856_v19 = vpack.c.bf16 %v147_v16, %v146_v15  ;;  %v148_v21 = vld [vmem:[#allocation6 + $0x260] sm:$0xff]  ;;  %v166_v23 = vld [vmem:[#allocation6 + $0x2f0] sm:$0xff] }
  0x5b   :  { %833 = vmatpush3.bf16.msra.mxu1 %v832_v37  ;;  %v858_v20 = vpack.c.bf16 %v165_v18, %v164_v17  ;;  %v149_v22 = vld [vmem:[#allocation6 + $0x268] sm:$0xff]  ;;  %v167_v24 = vld [vmem:[#allocation6 + $0x2f8] sm:$0xff]  ;;  %v150_v27 = vld [vmem:[#allocation6 + $0x270] sm:$0xff] }
  0x5c   :  { %866 = vmatprep.subr.bf16.mxu1 %v1008_v52  ;;  %246 = vmatmul.mubr.f32.vlgmr.msra.gmra.mrb[0].mxu0 %v65_v43  ;;  %v860_v25 = vpack.c.bf16 %v149_v22, %v148_v21  ;;  %v862_v26 = vpack.c.bf16 %v167_v24, %v166_v23  ;;  %v151_v28 = vld [vmem:[#allocation6 + $0x278] sm:$0xff]  ;;  %v69_v30 = vld [vmem:[#allocation3 + $0x20] sm:$0xff]  ;;  %v475_v31 = vld [vmem:[#allocation8] sm:$0xff] }
  0x5d   :  { %837 = vmatpush3.bf16.msra.mxu0 %v836_v44  ;;  %385 = vmatprep.mubr.f32.mxu0 %v70_v51  ;;  %v864_v29 = vpack.c.bf16 %v151_v28, %v150_v27  ;;  %v476_v32 = vld [vmem:[#allocation8 + $0x8] sm:$0xff]  ;;  %v477_v33 = vld [vmem:[#allocation8 + $0x10] sm:$0xff]  ;;  %v478_v35 = vld [vmem:[#allocation8 + $0x18] sm:$0xff] }
  0x5e   :  { %316 = vmatmul.mubr.f32.vlgmr.msra.gmra.mrb[0].mxu1 %v67_v45  ;;  %839 = vmatprep.subr.bf16.mxu0 %v838_v47  ;;  %v870_v34 = vpack.c.bf16 %v476_v32, %v475_v31  ;;  %v873_v36 = vpack.c.bf16 %v478_v35, %v477_v33  ;;  %v479_v37 = vld [vmem:[#allocation8 + $0x20] sm:$0xff]  ;;  %v480_v38 = vld [vmem:[#allocation8 + $0x28] sm:$0xff]  ;;  %v481_v40 = vld [vmem:[#allocation8 + $0x30] sm:$0xff] }
  0x5f   :  { %868 = vmatpush3.bf16.msra.mxu1 %v867_v55  ;;  %732 = vmatprep.mubr.msk.f32.mxu1 %vm1009_vm0, %v1010_v63  ;;  %v876_v39 = vpack.c.bf16 %v480_v38, %v479_v37  ;;  %v482_v41 = vld [vmem:[#allocation8 + $0x38] sm:$0xff]  ;;  %v483_v43 = vld [vmem:[#allocation8 + $0x40] sm:$0xff]  ;;  %v484_v44 = vld [vmem:[#allocation8 + $0x48] sm:$0xff] }
  0x60   :  { %869 = vmatprep.subr.bf16.mxu1 %v1008_v52  ;;  %v879_v42 = vpack.c.bf16 %v482_v41, %v481_v40  ;;  %v882_v45 = vpack.c.bf16 %v484_v44, %v483_v43  ;;  %v485_v46 = vld [vmem:[#allocation8 + $0x50] sm:$0xff]  ;;  %v486_v47 = vld [vmem:[#allocation8 + $0x58] sm:$0xff]  ;;  %v487_v49 = vld [vmem:[#allocation8 + $0x60] sm:$0xff] }
  0x61   :  { %841 = vmatpush3.bf16.msra.mxu0 %v840_v56  ;;  %v885_v48 = vpack.c.bf16 %v486_v47, %v485_v46  ;;  %v488_v50 = vld [vmem:[#allocation8 + $0x68] sm:$0xff]  ;;  %v489_v53 = vld [vmem:[#allocation8 + $0x70] sm:$0xff]  ;;  %v490_v54 = vld [vmem:[#allocation8 + $0x78] sm:$0xff] }
  0x62   :  { %843 = vmatprep.subr.bf16.mxu0 %v842_v58  ;;  %733 = vmatmul.mubr.msk.f32.vlgmr.msra.gmra.mrb[2].mxu1 %vm177_vm1, %v71_v0  ;;  %v888_v51 = vpack.c.bf16 %v488_v50, %v487_v49  ;;  %v891_v55 = vpack.c.bf16 %v490_v54, %v489_v53  ;;  %v599_v57 = vld [vmem:[%s1123_s2] ss:$0 sm:$0xff] }
  0x63   :  { %767 = vmatprep.mubr.msk.f32.mxu1 %vm1009_vm0, %v1010_v63  ;;  %871 = vmatpush3.bf16.msra.mxu1 %v870_v34 }
  0x64   :  { %872 = vmatprep.subr.bf16.mxu1 %v1008_v52 }
  0x65   :  { %845 = vmatpush3.bf16.msra.mxu0 %v844_v1 }
  0x66   :  { %847 = vmatprep.subr.bf16.mxu0 %v846_v2 }
  0x67   :  { %874 = vmatpush3.bf16.msra.mxu1 %v873_v36 }
  0x68   :  { %875 = vmatprep.subr.bf16.mxu1 %v1008_v52 }
  0x69   :  { %849 = vmatpush3.bf16.msra.mxu0 %v848_v7 }
  0x6a   :  { %851 = vmatprep.subr.bf16.mxu0 %v850_v8 }
  0x6b   :  { %877 = vmatpush3.bf16.msra.mxu1 %v876_v39 }
  0x6c   :  { %878 = vmatprep.subr.bf16.mxu1 %v1008_v52 }
  0x6d   :  { %853 = vmatpush3.bf16.msra.mxu0 %v852_v13  ;;  %v569_v13 = vand.u32 127, %v568_v12 }
  0x6e   :  { %855 = vmatprep.subr.bf16.mxu0 %v854_v14  ;;  %v602_v14 = vld [vmem:[%s1125_s4] ss:$0 sm:$0xff]  ;;  %s974_s4 = scalar_lea.vmem %s590_s12, 128 }
  0x6f   :  { %880 = vmatpush3.bf16.msra.mxu1 %v879_v42  ;;  %vm570_vm2 = vcmp.lt.s32.totalorder %v569_v13, 10  ;;  %p975_p10 = scmp.ne.s32.totalorder %s590_s12, %s974_s4  ;;  %p980_p12 = scmp.lt.s32.totalorder %s974_s4, %s974_s4 }
  0x70   :  { %881 = vmatprep.subr.bf16.mxu1 %v1008_v52 }
  0x71   :  { %857 = vmatpush3.bf16.msra.mxu0 %v856_v19  ;;  %p981_p13 = por %p980_p12, %p979_p11 }
  0x72   :  { %859 = vmatprep.subr.bf16.mxu0 %v858_v20 }
  0x73   :  { %883 = vmatpush3.bf16.msra.mxu1 %v882_v45  ;;  %p982_p0 = pnand %p981_p13, %p975_p10 }
  0x74   :  { %884 = vmatprep.subr.bf16.mxu1 %v1008_v52 }
  0x75   :  { %861 = vmatpush3.bf16.msra.mxu0 %v860_v25 }
  0x76   :  { %863 = vmatprep.subr.bf16.mxu0 %v862_v26 }
  0x77   :  { %886 = vmatpush3.bf16.msra.mxu1 %v885_v48 }
  0x78   :  { %887 = vmatprep.subr.bf16.mxu1 %v1008_v52 }
  0x79   :  { %865 = vmatpush3.bf16.msra.mxu0 %v864_v29 }
  0x7b   :  { %889 = vmatpush3.bf16.msra.mxu1 %v888_v51 }
  0x7c   :  { %386 = vmatmul.mubr.f32.vlgmr.msra.gmra.mrb[2].mxu0 %v69_v30  ;;  %890 = vmatprep.subr.bf16.mxu1 %v1008_v52 }
  0x7f   :  { %892 = vmatpush3.bf16.msra.mxu1 %v891_v55 }
  0xd4   :  { %v471_v7 = vpop.permute.xlu0 %470 }
 0x12f   :  { %v635_v56 = vpop.f32.mrb[0].mxu0 }
 0x130   :  { %v636_v58 = vpop.f32.mrb[1].mxu0 }
 0x131   :  { %v670_v59 = vpop.f32.mrb[0].mxu1  ;;  %v637_v60 = vadd.f32 %v636_v58, %v635_v56 }
 0x132   :  { %v671_v61 = vpop.f32.mrb[1].mxu1 }
 0x133   :  { %v672_v62 = vadd.f32 %v671_v61, %v670_v59  ;;  %v248_v63 = vadd.f32 %v637_v60, %v599_v57 }
 0x135   :  { %v318_v0 = vadd.f32 %v672_v62, %v248_v63  ;;  %v457_v1 = vpop.f32.mrb[2].mxu1 }
 0x136   :  { %v734_v2 = vpop.f32.mrb[3].mxu1 }
 0x14f   :  { %v705_v3 = vpop.f32.mrb[2].mxu0 }
 0x150   :  { %v706_v52 = vpop.f32.mrb[3].mxu0 }
 0x151   :  { %v707_v4 = vadd.f32 %v706_v52, %v705_v3 }
 0x153   :  { %v388_v5 = vadd.f32 %v707_v4, %v318_v0 }
 0x155   :  { %v458_v6 = vadd.f32 %v457_v1, %v388_v5 }
 0x157   :  { %v463_v8 = vmin.f32 %v458_v6, 0.0  ;;  %v461_v9 = vmax.f32 %v458_v6, 0.0 }
 0x159   :  { %v473_v10 = vmul.f32 %v471_v7, %v463_v8 }
 0x15b   :  { %v474_v11 = vadd.f32 %v473_v10, %v461_v9 }
 0x15d   :  { %768 = vmatmul.mubr.f32.vlgmr.msra.gmra.mrb[4].mxu1 %v474_v11 }
 0x230   :  { %v564_v15 = vpop.f32.mrb[4].mxu1 }
 0x231   :  { %v565_v16 = vadd.f32 %v602_v14, %v564_v15  ;;  %v769_v17 = vpop.f32.mrb[5].mxu1 }
 0x233   :  { %v571_v18 = vsel %vm570_vm2, %v565_v16, -1e+30 }
 0x234   :  { %572 = vmax.xlane.f32.xlu0 %v571_v18 }
 0x2c1   :  { %v573_v19 = vpop.xlane.xlu0 %572 }
 0x2c2   :  { %v574_v20 = vsub.f32 %v571_v18, %v573_v19 }
 0x2c4   :  { %v575_v21 = vmul.f32 1.442695, %v574_v20 }
 0x2c6   :  { %904 = vpow2.f32 %v575_v21 }
 0x2d0   :  { %v905_v22 = vpop.eup %904 }
 0x2d1   :  { %577 = vadd.xlane.f32.xlu1 %v905_v22 }
 0x35e   :  { %v578_v23 = vpop.xlane.xlu1 %577 }
 0x35f   :  { %906 = vlog2.f32 %v578_v23 }
 0x369   :  { %v907_v24 = vpop.eup %906 }
 0x36a   :  { %v580_v25 = vmul.f32 0.6931472, %v907_v24 }
 0x36c   :  { %v581_v26 = vsub.f32 %v574_v20, %v580_v25 }
 0x36e   :  { %582 = vst [vmem:[#allocation9] sm:$0xff] %v581_v26 }
 0x36f   :  { %985 = shalt.err (!%p982_p0)
}
 0x370   :  { %s986_s15 = scalar_lea.hbm %s1127_s6, 128 }
 0x371   :  { %p987_p1 = scmp.ne.s32.totalorder %s1127_s6, %s986_s15  ;;  %p990_p2 = scmp.lt.u32.totalorder %s986_s15, %s1127_s6 }
 0x373   :  { %p992_p3 = pnand %p990_p2, %p987_p1 }
 0x375   :  { %995 = shalt.err (!%p992_p3)
}
 0x376   :  { %592 = dma.vmem_to_hbm [thread:$0]  %s590_s12, 128, %s1127_s6, [#allocation5]  }
 0x377   :  { %1000 = dma.done.wait [#allocation5], 128  }
 0x378   :  { %1001 = vsyncadd [#allocation5], 4294967168 }
 0x379   :  { %596 = vsyncpa [#allocation4], 1 }
 0x37a   :  { %597 = vsyncpa [#allocation7], 1 }
 0x37b   :  { %598 = vsyncpa [#allocation5], 1 }

</bundles_post_ra>
